<compile_context>
chip_gen: v6e
topology: v6e:2x2x1
jax: 0.10.0
libtpu: 0.0.40
codegen_flags: <defaults>
</compile_context>

<pallas_src>
import math

import jax
import jax.numpy as jnp
from jax.experimental import pallas as pl
from jax.experimental.pallas import tpu as pltpu


def _gelu_tanh(x):
    # matches torch.nn.functional.gelu(x, approximate=True) (tanh approximation)
    c = math.sqrt(2.0 / math.pi)
    return 0.5 * x * (1.0 + jnp.tanh(c * (x + 0.044715 * x * x * x)))


def _round_up(x, m):
    return ((x + m - 1) // m) * m


# ---------------- pass 1: dense + GELU + LayerNorm ----------------
def transform_kernel(x_ref, w1_ref, b1_ref, gamma_ref, beta_ref, h_ref):
    """x_ref: (tm, H), w1_ref: (H, H), biases/LN params: (1, H), h_ref: (tm, H)."""
    # Native-dtype operands straight to the MXU, f32 accumulation.
    h = jnp.dot(x_ref[...], w1_ref[...], preferred_element_type=jnp.float32)
    h = h + b1_ref[...].astype(jnp.float32)
    h = _gelu_tanh(h)

    # LayerNorm over last axis, eps=1e-12 (biased variance), f32 math.
    mean = jnp.mean(h, axis=-1, keepdims=True)
    centered = h - mean
    var = jnp.mean(centered * centered, axis=-1, keepdims=True)
    inv = jax.lax.rsqrt(var + 1e-12)
    h = centered * inv * gamma_ref[...].astype(jnp.float32) \
        + beta_ref[...].astype(jnp.float32)

    h_ref[...] = h.astype(h_ref.dtype)


# ---------------- pass 2: decoder (tied embedding) matmul + bias ----------------
def decoder_kernel(h_ref, wd_ref, db_ref, o_ref):
    """h_ref: (tm, H), wd_ref: (H, tn), db_ref: (1, tn), o_ref: (tm, tn)."""
    logits = jnp.dot(h_ref[...], wd_ref[...], preferred_element_type=jnp.float32)
    o_ref[...] = (logits + db_ref[...].astype(jnp.float32)).astype(o_ref.dtype)


def bert_lm_prediction_head(hidden_states, dense_w_t, dense_b, ln_gamma,
                            ln_beta, decoder_w_t, decoder_bias,
                            *, tm_transform=256, tm_decode=256, tn=2048):
    """BERT LM prediction head forward.

    hidden_states: [B, S, H]
    dense_w_t:     [H, H]  dense weight, pre-transposed so the kernel does x @ W
    dense_b:       [H]
    ln_gamma/beta: [H]
    decoder_w_t:   [H, V]  tied embedding table, pre-transposed (torch shape is [V, H])
    decoder_bias:  [V]
    returns:       [B, S, V]
    """
    B, S, H = hidden_states.shape
    V = decoder_w_t.shape[1]
    T = B * S
    out_dtype = hidden_states.dtype

    # Tile sizes: token tiles multiple of 8, vocab tile multiple of 128,
    # clamped so small test shapes don't over-pad.
    t_min = _round_up(T, 8)
    tm_t = min(tm_transform, t_min)
    tm_d = min(tm_decode, t_min)
    tn = min(tn, _round_up(V, 128))
    T_pad = _round_up(T, math.lcm(tm_t, tm_d))
    V_pad = _round_up(V, tn)

    x = hidden_states.reshape(T, H)
    if T_pad != T:
        x = jnp.pad(x, ((0, T_pad - T), (0, 0)))

    # NOTE: in production, pad the decoder weight / bias once at parameter load
    # time instead of per call.
    wd = decoder_w_t
    db = decoder_bias.reshape(1, V)
    if V_pad != V:
        wd = jnp.pad(wd, ((0, 0), (0, V_pad - V)))
        db = jnp.pad(db, ((0, 0), (0, V_pad - V)))

    b1 = dense_b.reshape(1, H)
    gamma = ln_gamma.reshape(1, H)
    beta = ln_beta.reshape(1, H)

    nt_t = T_pad // tm_t
    nt_d = T_pad // tm_d
    nv = V_pad // tn

    # ---- pass 1: h = LayerNorm(gelu(x @ W1 + b1)) over token tiles ----
    h = pl.pallas_call(
        transform_kernel,
        out_shape=jax.ShapeDtypeStruct((T_pad, H), out_dtype),
        grid_spec=pltpu.PrefetchScalarGridSpec(
            num_scalar_prefetch=0,
            grid=(nt_t,),
            in_specs=[
                pl.BlockSpec((tm_t, H), lambda i: (i, 0)),   # x tile
                pl.BlockSpec((H, H), lambda i: (0, 0)),      # dense weight (resident)
                pl.BlockSpec((1, H), lambda i: (0, 0)),      # dense bias
                pl.BlockSpec((1, H), lambda i: (0, 0)),      # LN gamma
                pl.BlockSpec((1, H), lambda i: (0, 0)),      # LN beta
            ],
            out_specs=pl.BlockSpec((tm_t, H), lambda i: (i, 0)),
        ),
        compiler_params=pltpu.CompilerParams(
            dimension_semantics=("parallel",),
            vmem_limit_bytes=48 * 1024 * 1024),
    )(x, dense_w_t, b1, gamma, beta)

    # ---- pass 2: logits = h @ Wd + bias, vocab-major grid so each Wd slab
    #      is fetched from HBM once and reused across all token tiles ----
    logits = pl.pallas_call(
        decoder_kernel,
        out_shape=jax.ShapeDtypeStruct((T_pad, V_pad), out_dtype),
        grid_spec=pltpu.PrefetchScalarGridSpec(
            num_scalar_prefetch=0,
            grid=(nv, nt_d),                                 # vocab outer, token inner
            in_specs=[
                pl.BlockSpec((tm_d, H), lambda j, i: (i, 0)),  # h tile (re-streamed, small)
                pl.BlockSpec((H, tn), lambda j, i: (0, j)),    # decoder weight slab
                pl.BlockSpec((1, tn), lambda j, i: (0, j)),    # decoder bias slab
            ],
            out_specs=pl.BlockSpec((tm_d, tn), lambda j, i: (i, j)),  # lane-dense output
        ),
        compiler_params=pltpu.CompilerParams(
            # vocab axis parallel -> shards the big weight stream across
            # TensorCores on v7x; token axis inner keeps the weight-slab
            # revisit (no reduction axis, each output block written once).
            dimension_semantics=("parallel", "arbitrary"),
            vmem_limit_bytes=48 * 1024 * 1024),
    )(h, wd, db)

    if T_pad != T or V_pad != V:
        logits = logits[:T, :V]
    return logits.reshape(B, S, V)


def _reference(hidden_states, dense_w, dense_b, ln_gamma, ln_beta,
               emb_weights, decoder_bias):
    x = hidden_states.astype(jnp.float32)
    h = x @ dense_w.T.astype(jnp.float32) + dense_b
    h = _gelu_tanh(h)
    mean = jnp.mean(h, axis=-1, keepdims=True)
    var = jnp.mean((h - mean) ** 2, axis=-1, keepdims=True)
    h = (h - mean) * jax.lax.rsqrt(var + 1e-12) * ln_gamma + ln_beta
    return h @ emb_weights.T.astype(jnp.float32) + decoder_bias


if __name__ == "__main__":
    # Small shapes consistent with the module; V deliberately not a multiple of
    # 128 to exercise the padding/slicing path.
    B, S, H, V = 2, 8, 128, 300

    key = jax.random.PRNGKey(0)
    k1, k2, k3, k4 = jax.random.split(key, 4)

    hidden_states = jax.random.normal(k1, (B, S, H), dtype=jnp.float32)

    # Deterministic "kaiming-uniform"-like init for the dense weight/bias.
    bound_w = math.sqrt(6.0 / H)
    dense_w = jax.random.uniform(k2, (H, H), minval=-bound_w, maxval=bound_w,
                                 dtype=jnp.float32)
    bound_b = 1.0 / math.sqrt(H)
    dense_b = jax.random.uniform(k3, (H,), minval=-bound_b, maxval=bound_b,
                                 dtype=jnp.float32)

    # LayerNorm params (torch default init: ones / zeros).
    ln_gamma = jnp.ones((H,), dtype=jnp.float32)
    ln_beta = jnp.zeros((H,), dtype=jnp.float32)

    # Tied embedding table [V, H] (torch convention) and decoder bias (zeros).
    emb_weights = jax.random.normal(k4, (V, H), dtype=jnp.float32) * 0.02
    decoder_bias = jnp.zeros((V,), dtype=jnp.float32)

    # Hoist the transposes out of the per-call path (done once at param setup).
    dense_w_t = dense_w.T          # [H, H]
    decoder_w_t = emb_weights.T    # [H, V]

    out = bert_lm_prediction_head(hidden_states, dense_w_t, dense_b,
                                  ln_gamma, ln_beta, decoder_w_t, decoder_bias)
    out = jax.block_until_ready(out)

    ref = _reference(hidden_states, dense_w, dense_b, ln_gamma, ln_beta,
                     emb_weights, decoder_bias)
    assert out.shape == (B, S, V)
    assert jnp.allclose(out, ref, atol=5e-4, rtol=5e-4), "mismatch vs reference"

    print("KERNEL_OK")
</pallas_src>

<mosaic_0001>
module attributes {stable_mosaic.version = 11 : i64} {
  func.func @transform_kernel(%arg0: i32, %arg1: memref<16x128xf32, #tpu.memory_space<vmem>>, %arg2: memref<128x128xf32, #tpu.memory_space<vmem>>, %arg3: memref<1x128xf32, #tpu.memory_space<vmem>>, %arg4: memref<1x128xf32, #tpu.memory_space<vmem>>, %arg5: memref<1x128xf32, #tpu.memory_space<vmem>>, %arg6: memref<16x128xf32, #tpu.memory_space<vmem>>) attributes {dimension_semantics = [#tpu.dimension_semantics<parallel>], iteration_bounds = array<i64: 1>, scalar_prefetch = 0 : i64, scratch_operands = 0 : i64, tpu.core_type = #tpu.core_type<tc>, window_params = [{transform_indices = @transform_0, window_bounds = array<i64: 16, 128>}, {pipeline_mode = #tpu.pipeline_mode<synchronous>, transform_indices = @transform_1, window_bounds = array<i64: 128, 128>}, {pipeline_mode = #tpu.pipeline_mode<synchronous>, transform_indices = @transform_2, window_bounds = array<i64: 1, 128>}, {pipeline_mode = #tpu.pipeline_mode<synchronous>, transform_indices = @transform_3, window_bounds = array<i64: 1, 128>}, {pipeline_mode = #tpu.pipeline_mode<synchronous>, transform_indices = @transform_4, window_bounds = array<i64: 1, 128>}, {transform_indices = @transform_5, window_bounds = array<i64: 16, 128>}]} {
    %c0 = arith.constant 0 : index
    %c0_0 = arith.constant 0 : index
    %0 = vector.load %arg1[%c0, %c0_0] : memref<16x128xf32, #tpu.memory_space<vmem>>, vector<16x128xf32>
    %c0_1 = arith.constant 0 : index
    %c0_2 = arith.constant 0 : index
    %1 = vector.load %arg2[%c0_1, %c0_2] : memref<128x128xf32, #tpu.memory_space<vmem>>, vector<128x128xf32>
    %cst = arith.constant dense<0.000000e+00> : vector<16x128xf32>
    %2 = tpu.matmul %0, %1, %cst {dimension_numbers = #tpu.dot_dimension_numbers<[1], [0], [0], [1], [0, 0, 1, 1], [], []>} : vector<16x128xf32>, vector<128x128xf32>, vector<16x128xf32> -> vector<16x128xf32>
    %c0_3 = arith.constant 0 : index
    %c0_4 = arith.constant 0 : index
    %3 = vector.load %arg3[%c0_3, %c0_4] : memref<1x128xf32, #tpu.memory_space<vmem>>, vector<1x128xf32>
    %4 = vector.broadcast %3 : vector<1x128xf32> to vector<16x128xf32>
    %5 = arith.addf %2, %4 : vector<16x128xf32>
    %cst_5 = arith.constant 5.000000e-01 : f32
    %6 = vector.broadcast %cst_5 : f32 to vector<16x128xf32>
    %7 = arith.mulf %6, %5 : vector<16x128xf32>
    %cst_6 = arith.constant 4.471500e-02 : f32
    %8 = vector.broadcast %cst_6 : f32 to vector<16x128xf32>
    %9 = arith.mulf %8, %5 : vector<16x128xf32>
    %10 = arith.mulf %9, %5 : vector<16x128xf32>
    %11 = arith.mulf %10, %5 : vector<16x128xf32>
    %12 = arith.addf %5, %11 : vector<16x128xf32>
    %cst_7 = arith.constant 0.797884583 : f32
    %13 = vector.broadcast %cst_7 : f32 to vector<16x128xf32>
    %14 = arith.mulf %13, %12 : vector<16x128xf32>
    %15 = math.tanh %14 : vector<16x128xf32>
    %cst_8 = arith.constant 1.000000e+00 : f32
    %16 = vector.broadcast %cst_8 : f32 to vector<16x128xf32>
    %17 = arith.addf %16, %15 : vector<16x128xf32>
    %18 = arith.mulf %7, %17 : vector<16x128xf32>
    %cst_9 = arith.constant dense<0.000000e+00> : vector<16xf32>
    %19 = vector.multi_reduction <add>, %18, %cst_9 [1] : vector<16x128xf32> to vector<16xf32>
    %20 = vector.shape_cast %19 : vector<16xf32> to vector<16x1xf32>
    %cst_10 = arith.constant 1.280000e+02 : f32
    %21 = vector.broadcast %cst_10 : f32 to vector<16x1xf32>
    %22 = arith.divf %20, %21 : vector<16x1xf32>
    %23 = vector.broadcast %22 : vector<16x1xf32> to vector<16x128xf32>
    %24 = arith.subf %18, %23 : vector<16x128xf32>
    %25 = arith.mulf %24, %24 : vector<16x128xf32>
    %cst_11 = arith.constant dense<0.000000e+00> : vector<16xf32>
    %26 = vector.multi_reduction <add>, %25, %cst_11 [1] : vector<16x128xf32> to vector<16xf32>
    %27 = vector.shape_cast %26 : vector<16xf32> to vector<16x1xf32>
    %cst_12 = arith.constant 1.280000e+02 : f32
    %28 = vector.broadcast %cst_12 : f32 to vector<16x1xf32>
    %29 = arith.divf %27, %28 : vector<16x1xf32>
    %cst_13 = arith.constant 9.99999996E-13 : f32
    %30 = vector.broadcast %cst_13 : f32 to vector<16x1xf32>
    %31 = arith.addf %29, %30 : vector<16x1xf32>
    %32 = math.rsqrt %31 : vector<16x1xf32>
    %33 = vector.broadcast %32 : vector<16x1xf32> to vector<16x128xf32>
    %34 = arith.mulf %24, %33 : vector<16x128xf32>
    %c0_14 = arith.constant 0 : index
    %c0_15 = arith.constant 0 : index
    %35 = vector.load %arg4[%c0_14, %c0_15] : memref<1x128xf32, #tpu.memory_space<vmem>>, vector<1x128xf32>
    %36 = vector.broadcast %35 : vector<1x128xf32> to vector<16x128xf32>
    %37 = arith.mulf %34, %36 : vector<16x128xf32>
    %c0_16 = arith.constant 0 : index
    %c0_17 = arith.constant 0 : index
    %38 = vector.load %arg5[%c0_16, %c0_17] : memref<1x128xf32, #tpu.memory_space<vmem>>, vector<1x128xf32>
    %39 = vector.broadcast %38 : vector<1x128xf32> to vector<16x128xf32>
    %40 = arith.addf %37, %39 : vector<16x128xf32>
    %c0_18 = arith.constant 0 : index
    %c0_19 = arith.constant 0 : index
    %41 = vector.load %arg6[%c0_18, %c0_19] : memref<16x128xf32, #tpu.memory_space<vmem>>, vector<16x128xf32>
    tpu.vector_store %arg6[%c0_18, %c0_19], %40 {strides = array<i32>} : memref<16x128xf32, #tpu.memory_space<vmem>>, vector<16x128xf32>,
    return
  }
  func.func @transform_0(%arg0: i32) -> (i32, i32) {
    %c0_i32 = arith.constant 0 : i32
    %c0_i32_0 = arith.constant 0 : i32
    return %arg0, %c0_i32 : i32, i32
  }
  func.func @transform_1(%arg0: i32) -> (i32, i32) {
    %c0_i32 = arith.constant 0 : i32
    %c0_i32_0 = arith.constant 0 : i32
    %c0_i32_1 = arith.constant 0 : i32
    return %c0_i32, %c0_i32_0 : i32, i32
  }
  func.func @transform_2(%arg0: i32) -> (i32, i32) {
    %c0_i32 = arith.constant 0 : i32
    %c0_i32_0 = arith.constant 0 : i32
    %c0_i32_1 = arith.constant 0 : i32
    return %c0_i32, %c0_i32_0 : i32, i32
  }
  func.func @transform_3(%arg0: i32) -> (i32, i32) {
    %c0_i32 = arith.constant 0 : i32
    %c0_i32_0 = arith.constant 0 : i32
    %c0_i32_1 = arith.constant 0 : i32
    return %c0_i32, %c0_i32_0 : i32, i32
  }
  func.func @transform_4(%arg0: i32) -> (i32, i32) {
    %c0_i32 = arith.constant 0 : i32
    %c0_i32_0 = arith.constant 0 : i32
    %c0_i32_1 = arith.constant 0 : i32
    return %c0_i32, %c0_i32_0 : i32, i32
  }
  func.func @transform_5(%arg0: i32) -> (i32, i32) {
    %c0_i32 = arith.constant 0 : i32
    %c0_i32_0 = arith.constant 0 : i32
    return %arg0, %c0_i32 : i32, i32
  }
}

</mosaic_0001>

<bundles_post_ra>
// kernel: tpu_custom_call.1
= control target key start
LH: loop header
LB: loop body
LE: loop exit
PB: predicated region body
PF: predicated region fallthrough
CT: control target
= control target key end

     0   :  { %10 = vsyncpa [#allocation3], 0  ;;  %s425_s0 = inlined_call_operand.hbm [shape: f32[16,128], index: 0, kind: input, shape index: {}]   ;;  %s426_s1 = inlined_call_operand.hbm [shape: f32[128,128], index: 1, kind: input, shape index: {}]   ;;  %s427_s2 = inlined_call_operand.vmem [shape: f32[1,128], index: 2, kind: input, shape index: {}]   ;;  %s428_s3 = inlined_call_operand.vmem [shape: f32[1,128], index: 3, kind: input, shape index: {}]   ;;  %s429_s4 = inlined_call_operand.vmem [shape: f32[1,128], index: 4, kind: input, shape index: {}]   ;;  %s430_s5 = inlined_call_operand.hbm [shape: f32[16,128], index: 5, kind: output, shape index: {}]  }
   0x1   :  { %11 = vsyncpa [#allocation6], 0 }
   0x2   :  { %12 = vsyncpa [#allocation4], 0  ;;  %s363_s18 = smov [#allocation2]  }
   0x3   :  { %s18_s19 = sshll.u32 %s363_s18, 4  ;;  %s19_s19 = int_to_ptr.vmem [resolvable:$true] %s18_s19 }
   0x4   :  { %s305_s20 = scalar_lea.vmem %s19_s19, 256  ;;  %p310_p1 = scmp.lt.s32.totalorder %s19_s19, %s19_s19 }
   0x5   :  { %p306_p0 = scmp.ne.s32.totalorder %s19_s19, %s305_s20  ;;  %p311_p2 = scmp.lt.s32.totalorder %s305_s20, %s305_s20 }
   0x7   :  { %p312_p3 = por %p311_p2, %p310_p1 }
   0x9   :  { %p313_p4 = pnand %p312_p3, %p306_p0 }
   0xb   :  { %316 = shalt.err (!%p313_p4)
}
   0xc   :  { %s364_s21 = smov 128   ;;  %s365_s22 = smov 8  }
   0xd   :  { %24 = dma.hbm_to_vmem [thread:$0]  %s425_s0, 256, %s19_s19, [#allocation3], %s364_s21, %s364_s21, %s365_s22  }
   0xe   :  { %s366_s25 = smov [#allocation5]  }
   0xf   :  { %s30_s26 = sshll.u32 %s366_s25, 4  ;;  %s31_s26 = int_to_ptr.vmem [resolvable:$true] %s30_s26 }
  0x10   :  { %s325_s27 = scalar_lea.vmem %s31_s26, 2048  ;;  %p330_p6 = scmp.lt.s32.totalorder %s31_s26, %s31_s26 }
  0x11   :  { %p326_p5 = scmp.ne.s32.totalorder %s31_s26, %s325_s27  ;;  %p331_p7 = scmp.lt.s32.totalorder %s325_s27, %s325_s27 }
  0x13   :  { %p332_p8 = por %p331_p7, %p330_p6 }
  0x15   :  { %p333_p9 = pnand %p332_p8, %p326_p5 }
  0x17   :  { %336 = shalt.err (!%p333_p9)
}
  0x18   :  { %36 = dma.hbm_to_vmem [thread:$0]  %s426_s1, 2048, %s31_s26, [#allocation6], %s364_s21, %s364_s21, %s365_s22  }
  0x19   :  { %357 = dma.done.wait [#allocation3], 256  }
  0x1a   :  { %358 = vsyncadd [#allocation3], 4294967040 }
  0x1b   :  { %359 = dma.done.wait [#allocation6], 2048  }
  0x1c   :  { %360 = vsyncadd [#allocation6], 4294965248  ;;  %v66_v0 = vld [vmem:[#allocation5 + $0x78] sm:$0xff]  ;;  %v65_v1 = vld [vmem:[#allocation5 + $0x70] sm:$0xff]  ;;  %s367_s8 = smov [#allocation7]  }
  0x1d   :  { %249 = vmatprep.subr.mxu0 %v66_v0  ;;  %v64_v2 = vld [vmem:[#allocation5 + $0x68] sm:$0xff]  ;;  %v63_v3 = vld [vmem:[#allocation5 + $0x60] sm:$0xff]  ;;  %v49_v4 = vld [vmem:[#allocation2] sm:$0xff]  ;;  %s215_s9 = sshll.u32 %s367_s8, 4  ;;  %s216_s9 = int_to_ptr.vmem [resolvable:$true] %s215_s9 }
  0x1e   :  { %250 = vmatpush3.msra.mxu0 %v66_v0  ;;  %v62_v5 = vld [vmem:[#allocation5 + $0x58] sm:$0xff]  ;;  %281 = vmatprep.mubr.f32.mxu0 %v49_v4  ;;  %v61_v6 = vld [vmem:[#allocation5 + $0x50] sm:$0xff]  ;;  %v60_v7 = vld [vmem:[#allocation5 + $0x48] sm:$0xff]  ;;  %s337_s10 = scalar_lea.vmem %s216_s9, 256  ;;  %p342_p11 = scmp.lt.s32.totalorder %s216_s9, %s216_s9 }
  0x1f   :  { %251 = vmatprep.subr.mxu0 %v65_v1  ;;  %v59_v8 = vld [vmem:[#allocation5 + $0x40] sm:$0xff]  ;;  %v58_v9 = vld [vmem:[#allocation5 + $0x38] sm:$0xff]  ;;  %v57_v10 = vld [vmem:[#allocation5 + $0x30] sm:$0xff]  ;;  %p338_p10 = scmp.ne.s32.totalorder %s216_s9, %s337_s10  ;;  %p343_p12 = scmp.lt.s32.totalorder %s337_s10, %s337_s10 }
  0x20   :  { %252 = vmatpush3.msra.mxu0 %v65_v1  ;;  %v56_v11 = vld [vmem:[#allocation5 + $0x28] sm:$0xff]  ;;  %v55_v12 = vld [vmem:[#allocation5 + $0x20] sm:$0xff]  ;;  %v54_v13 = vld [vmem:[#allocation5 + $0x18] sm:$0xff] }
  0x21   :  { %253 = vmatprep.subr.mxu0 %v64_v2  ;;  %v53_v14 = vld [vmem:[#allocation5 + $0x10] sm:$0xff]  ;;  %v52_v15 = vld [vmem:[#allocation5 + $0x8] sm:$0xff]  ;;  %v51_v16 = vld [vmem:[#allocation5] sm:$0xff]  ;;  %p344_p13 = por %p343_p12, %p342_p11 }
  0x22   :  { %254 = vmatpush3.msra.mxu0 %v64_v2  ;;  %v50_v17 = vld [vmem:[#allocation2 + $0x8] sm:$0xff]  ;;  %v228_v18 = vld [vmem:[%s427_s2] ss:$0 sm:$0xff] }
  0x23   :  { %255 = vmatprep.subr.mxu0 %v63_v3  ;;  %v229_v56 = vld [vmem:[%s428_s3] ss:$0 sm:$0xff]  ;;  %p345_p0 = pnand %p344_p13, %p338_p10 }
  0x24   :  { %256 = vmatpush3.msra.mxu0 %v63_v3  ;;  %v230_v58 = vld [vmem:[%s429_s4] ss:$0 sm:$0xff] }
  0x25   :  { %257 = vmatprep.subr.mxu0 %v62_v5 }
  0x26   :  { %258 = vmatpush3.msra.mxu0 %v62_v5 }
  0x27   :  { %259 = vmatprep.subr.mxu0 %v61_v6 }
  0x28   :  { %260 = vmatpush3.msra.mxu0 %v61_v6 }
  0x29   :  { %261 = vmatprep.subr.mxu0 %v60_v7 }
  0x2a   :  { %262 = vmatpush3.msra.mxu0 %v60_v7 }
  0x2b   :  { %263 = vmatprep.subr.mxu0 %v59_v8 }
  0x2c   :  { %264 = vmatpush3.msra.mxu0 %v59_v8 }
  0x2d   :  { %265 = vmatprep.subr.mxu0 %v58_v9 }
  0x2e   :  { %266 = vmatpush3.msra.mxu0 %v58_v9 }
  0x2f   :  { %267 = vmatprep.subr.mxu0 %v57_v10 }
  0x30   :  { %268 = vmatpush3.msra.mxu0 %v57_v10 }
  0x31   :  { %269 = vmatprep.subr.mxu0 %v56_v11 }
  0x32   :  { %270 = vmatpush3.msra.mxu0 %v56_v11 }
  0x33   :  { %271 = vmatprep.subr.mxu0 %v55_v12 }
  0x34   :  { %272 = vmatpush3.msra.mxu0 %v55_v12 }
  0x35   :  { %273 = vmatprep.subr.mxu0 %v54_v13 }
  0x36   :  { %274 = vmatpush3.msra.mxu0 %v54_v13 }
  0x37   :  { %275 = vmatprep.subr.mxu0 %v53_v14 }
  0x38   :  { %276 = vmatpush3.msra.mxu0 %v53_v14 }
  0x39   :  { %277 = vmatprep.subr.mxu0 %v52_v15 }
  0x3a   :  { %278 = vmatpush3.msra.mxu0 %v52_v15 }
  0x3b   :  { %279 = vmatprep.subr.mxu0 %v51_v16 }
  0x3c   :  { %280 = vmatpush3.msra.mxu0 %v51_v16 }
  0x3d   :  { %282 = vmatmul.mubr.f32.vlgmr.msra.gmra.mxu0 %v50_v17 }
  0xfd   :  { %v283_v19 = vpop.f32.mrf.mxu0 }
  0xfe   :  { %v146_v20 = vadd.f32 %v283_v19, %v228_v18 }
  0xff   :  { %v140_v21 = vpop.f32.mrf.mxu0 }
 0x100   :  { %v152_v22 = vmul.f32 0.044715, %v146_v20  ;;  %v141_v23 = vadd.f32 %v228_v18, %v140_v21  ;;  %v150_v39 = vmul.f32 0.5, %v146_v20 }
 0x102   :  { %v151_v24 = vmul.f32 0.044715, %v141_v23  ;;  %v154_v25 = vmul.f32 %v152_v22, %v146_v20  ;;  %v149_v35 = vmul.f32 0.5, %v141_v23 }
 0x104   :  { %v153_v26 = vmul.f32 %v151_v24, %v141_v23  ;;  %v156_v27 = vmul.f32 %v154_v25, %v146_v20 }
 0x106   :  { %v155_v28 = vmul.f32 %v153_v26, %v141_v23  ;;  %v158_v29 = vadd.f32 %v156_v27, %v146_v20 }
 0x108   :  { %v157_v30 = vadd.f32 %v155_v28, %v141_v23  ;;  %v160_v31 = vmul.f32 0.7978846, %v158_v29 }
 0x10a   :  { %v159_v32 = vmul.f32 0.7978846, %v157_v30  ;;  %289 = vtanh.f32 %v160_v31 }
 0x10c   :  { %291 = vtanh.f32 %v159_v32 }
 0x117   :  { %v290_v33 = vpop.eup %289 }
 0x118   :  { %v164_v38 = vadd.f32 1.0, %v290_v33 }
 0x119   :  { %v292_v34 = vpop.eup %291 }
 0x11a   :  { %v163_v36 = vadd.f32 1.0, %v292_v34  ;;  %v166_v40 = vmul.f32 %v164_v38, %v150_v39 }
 0x11c   :  { %v165_v37 = vmul.f32 %v163_v36, %v149_v35 }
 0x11e   :  { %167 = vadd.xlane.f32.xlu0 %v165_v37 }
 0x122   :  { %169 = vadd.xlane.f32.xlu0 %v166_v40 }
 0x1a7   :  { %v168_v41 = vpop.xlane.xlu0 %167 }
 0x1a8   :  { %v172_v42 = vmul.f32 0.0078125, %v168_v41 }
 0x1aa   :  { %v174_v43 = vsub.f32 %v165_v37, %v172_v42 }
 0x1ab   :  { %v170_v44 = vpop.xlane.xlu0 %169 }
 0x1ac   :  { %v173_v45 = vmul.f32 0.0078125, %v170_v44  ;;  %v176_v46 = vmul.f32 %v174_v43, %v174_v43 }
 0x1ae   :  { %v175_v47 = vsub.f32 %v166_v40, %v173_v45  ;;  %178 = vadd.xlane.f32.xlu1 %v176_v46 }
 0x1b0   :  { %v177_v48 = vmul.f32 %v175_v47, %v175_v47 }
 0x1b2   :  { %180 = vadd.xlane.f32.xlu1 %v177_v48 }
 0x237   :  { %v179_v49 = vpop.xlane.xlu1 %178 }
 0x238   :  { %v182_v50 = vmul.f32 0.0078125, %v179_v49 }
 0x23a   :  { %v184_v51 = vadd.f32 1e-12, %v182_v50 }
 0x23b   :  { %v181_v52 = vpop.xlane.xlu1 %180 }
 0x23c   :  { %293 = vrsqrt.f32 %v184_v51  ;;  %v183_v53 = vmul.f32 0.0078125, %v181_v52 }
 0x23e   :  { %v185_v54 = vadd.f32 1e-12, %v183_v53 }
 0x240   :  { %295 = vrsqrt.f32 %v185_v54 }
 0x249   :  { %v294_v55 = vpop.eup %293 }
 0x24a   :  { %v188_v57 = vmul.f32 %v294_v55, %v174_v43 }
 0x24c   :  { %v197_v59 = vmul.f32 %v229_v56, %v188_v57 }
 0x24d   :  { %v296_v60 = vpop.eup %295 }
 0x24e   :  { %v189_v61 = vmul.f32 %v296_v60, %v175_v47  ;;  %v206_v62 = vadd.f32 %v230_v58, %v197_v59 }
 0x250   :  { %v198_v63 = vmul.f32 %v229_v56, %v189_v61  ;;  %208 = vst [vmem:[#allocation7] sm:$0xff] %v206_v62 }
 0x252   :  { %v207_v0 = vadd.f32 %v230_v58, %v198_v63 }
 0x254   :  { %209 = vst [vmem:[#allocation7 + $0x8] sm:$0xff] %v207_v0 }
 0x255   :  { %348 = shalt.err (!%p345_p0)
}
 0x256   :  { %221 = dma.vmem_to_hbm [thread:$0]  %s216_s9, 256, %s430_s5, [#allocation4], %s364_s21, %s364_s21, %s365_s22  }
 0x257   :  { %361 = dma.done.wait [#allocation4], 256  }
 0x258   :  { %362 = vsyncadd [#allocation4], 4294967040 }
 0x259   :  { %225 = vsyncpa [#allocation3], 1 }
 0x25a   :  { %226 = vsyncpa [#allocation6], 1 }
 0x25b   :  { %227 = vsyncpa [#allocation4], 1 }

</bundles_post_ra>
